<compile_context>
chip_gen: v5e
topology: v5e:2x2
jax: 0.10.0
libtpu: 0.0.40
codegen_flags: <defaults>
</compile_context>

<pallas_src>
import jax
import jax.numpy as jnp
from jax.experimental import pallas as pl
from jax.experimental.pallas import tpu as pltpu

LANE = 128
VMEM_LIMIT = 48 * 1024 * 1024  # safe on v5e/v6e (128 MiB phys) and v7x (64 MiB phys)


def _round_up(x, m):
    return ((x + m - 1) // m) * m


# ---------------------------------------------------------------------------
# Kernel A: feature transform XW = X @ W, computed ONCE (hoisted out of the
# aggregation grid). Row-tiled over X, W resident, bf16 output feeds the MXU
# fast path of the aggregation pass.
# ---------------------------------------------------------------------------
def xw_kernel(x_ref, w_ref, o_ref):
    o_ref[...] = jnp.dot(
        x_ref[...], w_ref[...], preferred_element_type=jnp.float32
    ).astype(o_ref.dtype)


def _feature_transform(x, w, tm):
    n_pad, f_in = x.shape
    f_out = w.shape[1]
    return pl.pallas_call(
        xw_kernel,
        grid=(n_pad // tm,),
        in_specs=[
            pl.BlockSpec((tm, f_in), lambda i: (i, 0)),      # X rows (streamed)
            pl.BlockSpec((f_in, f_out), lambda i: (0, 0)),   # W (resident)
        ],
        out_specs=pl.BlockSpec((tm, f_out), lambda i: (i, 0)),
        out_shape=jax.ShapeDtypeStruct((n_pad, f_out), jnp.bfloat16),
        compiler_params=pltpu.CompilerParams(
            dimension_semantics=("parallel",),
            vmem_limit_bytes=VMEM_LIMIT,
        ),
    )(x, w)


# ---------------------------------------------------------------------------
# Kernel B: aggregation  out = act(A_hat @ XW + b)  [optionally * dropout].
# grid = (row_tiles, k_tiles); row axis "parallel", reduction axis "arbitrary".
# ---------------------------------------------------------------------------
def gcn_agg_l1_kernel(a_ref, xw_ref, b_ref, drop_ref, o_ref, acc_ref):
    """Layer 1: accumulate A@XW in f32 scratch, finalize bias+ReLU+dropout,
    emit bf16 (feeds layer-2 MXU)."""
    k = pl.program_id(1)

    @pl.when(k == 0)
    def _():
        acc_ref[...] = jnp.zeros_like(acc_ref)

    acc_ref[...] += jnp.dot(
        a_ref[...], xw_ref[...], preferred_element_type=jnp.float32
    )

    @pl.when(k == pl.num_programs(1) - 1)
    def _():
        h = jnp.maximum(acc_ref[...] + b_ref[...], 0.0)          # bias + ReLU (f32)
        o_ref[...] = (h * drop_ref[...].astype(jnp.float32)).astype(o_ref.dtype)


def gcn_agg_l2_kernel(a_ref, xw_ref, b_ref, o_ref):
    """Layer 2: accumulate directly into the resident f32 output block,
    finalize bias + ReLU (no scratch needed)."""
    k = pl.program_id(1)

    @pl.when(k == 0)
    def _():
        o_ref[...] = jnp.zeros_like(o_ref)

    o_ref[...] += jnp.dot(
        a_ref[...], xw_ref[...], preferred_element_type=jnp.float32
    )

    @pl.when(k == pl.num_programs(1) - 1)
    def _():
        o_ref[...] = jnp.maximum(o_ref[...] + b_ref[...], 0.0)


def _gcn_aggregate(a, xw, b, drop_scale, out_dtype, tm, tk):
    """a: (Np, Np) bf16 normalized adjacency; xw: (Np, Fout) bf16;
    b: (1, Fout) f32; drop_scale: (Np, Fout) bf16 or None."""
    n_pad = a.shape[0]
    f_out = xw.shape[1]
    grid = (n_pad // tm, n_pad // tk)

    in_specs = [
        pl.BlockSpec((tm, tk), lambda i, k: (i, k)),       # A_hat tile (streamed)
        pl.BlockSpec((tk, f_out), lambda i, k: (k, 0)),    # XW rows for this k
        pl.BlockSpec((1, f_out), lambda i, k: (0, 0)),     # bias (resident)
    ]
    args = [a, xw, b]

    if drop_scale is not None:
        in_specs.append(pl.BlockSpec((tm, f_out), lambda i, k: (i, 0)))
        args.append(drop_scale)
        kernel = gcn_agg_l1_kernel
        scratch_shapes = [pltpu.VMEM((tm, f_out), jnp.float32)]
    else:
        kernel = gcn_agg_l2_kernel
        scratch_shapes = []

    return pl.pallas_call(
        kernel,
        grid=grid,
        in_specs=in_specs,
        out_specs=pl.BlockSpec((tm, f_out), lambda i, k: (i, 0)),
        out_shape=jax.ShapeDtypeStruct((n_pad, f_out), out_dtype),
        scratch_shapes=scratch_shapes,
        compiler_params=pltpu.CompilerParams(
            dimension_semantics=("parallel", "arbitrary"),
            vmem_limit_bytes=VMEM_LIMIT,
        ),
    )(*args)


# ---------------------------------------------------------------------------
# Plain-JAX glue: edge_index -> dense normalized adjacency, padding, dropout.
# ---------------------------------------------------------------------------
def gcn_normalized_adjacency(edge_index, num_nodes):
    """edge_index: (2, E) int32 [src; dst]. Returns D^-1/2 (A+I) D^-1/2, (N,N) f32."""
    src, dst = edge_index[0], edge_index[1]
    a = jnp.zeros((num_nodes, num_nodes), jnp.float32)
    a = a.at[dst, src].set(1.0)                         # simple-graph adjacency
    a = a + jnp.eye(num_nodes, dtype=jnp.float32)       # self loops
    deg = jnp.sum(a, axis=1)
    d_inv_sqrt = jnp.where(deg > 0, 1.0 / jnp.sqrt(deg), 0.0)
    return a * d_inv_sqrt[:, None] * d_inv_sqrt[None, :]


def _pad2(arr, rows, cols):
    r, c = arr.shape
    return jnp.pad(arr, ((0, rows - r), (0, cols - c)))


def _node_tiling(n):
    """Pick node padding + A tile size.

    Big tiles (up to 512) keep the HBM-bound A stream near roofline; the
    thresholds guarantee >=2 row tiles whenever we tile at all (so v7x's two
    TensorCores both get work) and 256-granular contraction tiles on larger
    graphs (v6e/v7x MXU is 2x256^2). Tiny graphs use a single full-extent
    block.
    """
    if n >= 1024:
        tile = 512
    elif n >= 512:
        tile = 256
    elif n >= 256:
        tile = 128
    else:
        n_pad = _round_up(n, 16)
        return n_pad, n_pad, n_pad
    n_pad = _round_up(n, tile)
    return n_pad, tile, tile


def gnn_forward(x, edge_index, params, *, dropout_seed=0, dropout_p=0.5,
                training=True):
    n, f_in = x.shape
    w1, b1, w2, b2 = params
    hidden = w1.shape[1]
    out_dim = w2.shape[1]

    n_pad, tm, tk = _node_tiling(n)

    # Pad feature dims to full 128-lane width (lane-dense matmuls and stores).
    f_in_p = _round_up(f_in, LANE)
    hid_p = _round_up(hidden, LANE)
    out_p = _round_up(out_dim, LANE)

    a_norm = gcn_normalized_adjacency(edge_index, n)
    a_p = _pad2(a_norm, n_pad, n_pad).astype(jnp.bfloat16)
    x_p = _pad2(x, n_pad, f_in_p).astype(jnp.bfloat16)
    w1_p = _pad2(w1, f_in_p, hid_p).astype(jnp.bfloat16)
    w2_p = _pad2(w2, hid_p, out_p).astype(jnp.bfloat16)
    b1_p = _pad2(b1.reshape(1, -1), 1, hid_p).astype(jnp.float32)
    b2_p = _pad2(b2.reshape(1, -1), 1, out_p).astype(jnp.float32)

    # F.dropout default: p=0.5, training=True. Inverted-dropout scale in bf16
    # (0 and 1/(1-p) are exactly representable) to halve HBM traffic.
    if training and dropout_p > 0.0:
        keep = jax.random.bernoulli(
            jax.random.PRNGKey(dropout_seed), p=1.0 - dropout_p,
            shape=(n_pad, hid_p),
        )
        drop_scale = (keep.astype(jnp.float32) * (1.0 / (1.0 - dropout_p))
                      ).astype(jnp.bfloat16)
    else:
        drop_scale = jnp.ones((n_pad, hid_p), jnp.bfloat16)

    # ---- layer 1: (X @ W1) once, then A_hat aggregation + bias + ReLU + dropout
    xw1 = _feature_transform(x_p, w1_p, tm)
    h = _gcn_aggregate(a_p, xw1, b1_p, drop_scale, jnp.bfloat16, tm, tk)

    # ---- layer 2: (H @ W2) once, then A_hat aggregation + bias + ReLU (f32 out)
    xw2 = _feature_transform(h, w2_p, tm)
    o = _gcn_aggregate(a_p, xw2, b2_p, None, jnp.float32, tm, tk)

    out = o[:n, :out_dim]
    return jnp.squeeze(out)   # matches torch x.squeeze()


def init_params(key, input_dim, hidden_dim, output_dim):
    k1, k2 = jax.random.split(key)
    w1 = jax.random.normal(k1, (input_dim, hidden_dim), jnp.float32) * (
        1.0 / jnp.sqrt(float(input_dim))
    )
    b1 = jnp.zeros((hidden_dim,), jnp.float32)
    w2 = jax.random.normal(k2, (hidden_dim, output_dim), jnp.float32) * (
        1.0 / jnp.sqrt(float(hidden_dim))
    )
    b2 = jnp.zeros((output_dim,), jnp.float32)
    return w1, b1, w2, b2


if __name__ == "__main__":
    key = jax.random.PRNGKey(0)
    k_x, k_p = jax.random.split(key)

    num_nodes = 16
    input_dim, hidden_dim, output_dim = 8, 32, 16

    # node features (data.x)
    x = jax.random.normal(k_x, (num_nodes, input_dim), jnp.float32)

    # deterministic ring graph, both directions (data.edge_index), shape (2, 2N)
    idx = jnp.arange(num_nodes, dtype=jnp.int32)
    nxt = (idx + 1) % num_nodes
    edge_index = jnp.stack(
        [jnp.concatenate([idx, nxt]), jnp.concatenate([nxt, idx])], axis=0
    )

    params = init_params(k_p, input_dim, hidden_dim, output_dim)

    out = gnn_forward(x, edge_index, params, dropout_seed=0)
    out = jax.block_until_ready(out)

    assert out.shape == (num_nodes, output_dim)
    assert bool(jnp.all(out >= 0.0))  # final ReLU
    print("KERNEL_OK")
</pallas_src>

<mosaic_0001>
module attributes {stable_mosaic.version = 11 : i64} {
  func.func @xw_kernel(%arg0: i32, %arg1: memref<16x128xbf16, #tpu.memory_space<vmem>>, %arg2: memref<128x128xbf16, #tpu.memory_space<vmem>>, %arg3: memref<16x128xbf16, #tpu.memory_space<vmem>>) attributes {dimension_semantics = [#tpu.dimension_semantics<parallel>], iteration_bounds = array<i64: 1>, scalar_prefetch = 0 : i64, scratch_operands = 0 : i64, tpu.core_type = #tpu.core_type<tc>, window_params = [{transform_indices = @transform_0, window_bounds = array<i64: 16, 128>}, {pipeline_mode = #tpu.pipeline_mode<synchronous>, transform_indices = @transform_1, window_bounds = array<i64: 128, 128>}, {transform_indices = @transform_2, window_bounds = array<i64: 16, 128>}]} {
    %c0 = arith.constant 0 : index
    %c0_0 = arith.constant 0 : index
    %0 = vector.load %arg1[%c0, %c0_0] : memref<16x128xbf16, #tpu.memory_space<vmem>>, vector<16x128xbf16>
    %c0_1 = arith.constant 0 : index
    %c0_2 = arith.constant 0 : index
    %1 = vector.load %arg2[%c0_1, %c0_2] : memref<128x128xbf16, #tpu.memory_space<vmem>>, vector<128x128xbf16>
    %cst = arith.constant dense<0.000000e+00> : vector<16x128xf32>
    %2 = tpu.matmul %0, %1, %cst {dimension_numbers = #tpu.dot_dimension_numbers<[1], [0], [0], [1], [0, 0, 1, 1], [], []>} : vector<16x128xbf16>, vector<128x128xbf16>, vector<16x128xf32> -> vector<16x128xf32>
    %3 = arith.truncf %2 : vector<16x128xf32> to vector<16x128xbf16>
    %c0_3 = arith.constant 0 : index
    %c0_4 = arith.constant 0 : index
    %4 = vector.load %arg3[%c0_3, %c0_4] : memref<16x128xbf16, #tpu.memory_space<vmem>>, vector<16x128xbf16>
    tpu.vector_store %arg3[%c0_3, %c0_4], %3 {strides = array<i32>} : memref<16x128xbf16, #tpu.memory_space<vmem>>, vector<16x128xbf16>,
    return
  }
  func.func @transform_0(%arg0: i32) -> (i32, i32) {
    %c0_i32 = arith.constant 0 : i32
    %c0_i32_0 = arith.constant 0 : i32
    return %arg0, %c0_i32 : i32, i32
  }
  func.func @transform_1(%arg0: i32) -> (i32, i32) {
    %c0_i32 = arith.constant 0 : i32
    %c0_i32_0 = arith.constant 0 : i32
    %c0_i32_1 = arith.constant 0 : i32
    return %c0_i32, %c0_i32_0 : i32, i32
  }
  func.func @transform_2(%arg0: i32) -> (i32, i32) {
    %c0_i32 = arith.constant 0 : i32
    %c0_i32_0 = arith.constant 0 : i32
    return %arg0, %c0_i32 : i32, i32
  }
}

</mosaic_0001>

<bundles_post_ra>
// kernel: tpu_custom_call.1
= control target key start
LH: loop header
LB: loop body
LE: loop exit
PB: predicated region body
PF: predicated region fallthrough
CT: control target
= control target key end

     0   :  { %7 = vsyncpa [#allocation3], 0  ;;  %s325_s0 = inlined_call_operand.hbm [shape: bf16[16,128], index: 0, kind: input, shape index: {}]   ;;  %s326_s1 = inlined_call_operand.hbm [shape: bf16[128,128], index: 1, kind: input, shape index: {}]   ;;  %s327_s2 = inlined_call_operand.hbm [shape: bf16[16,128], index: 2, kind: output, shape index: {}]  }
   0x1   :  { %8 = vsyncpa [#allocation6], 0 }
   0x2   :  { %9 = vsyncpa [#allocation4], 0  ;;  %s14_s11 = sshll.u32 %s325_s0, 4  ;;  %s287_s12 = smov [#allocation2]   ;;  %s15_s11 = int_to_ptr.hbm [resolvable:$true] %s14_s11 }
   0x3   :  { %s16_s13 = sshll.u32 %s287_s12, 4  ;;  %s27_s16 = sshll.u32 %s326_s1, 4  ;;  %s17_s13 = int_to_ptr.vmem [resolvable:$true] %s16_s13  ;;  %s28_s16 = int_to_ptr.hbm [resolvable:$true] %s27_s16 }
   0x4   :  { %s288_s17 = smov 64   ;;  %s289_s18 = smov 4  }
   0x5   :  { %22 = dma.hbm_to_vmem [thread:$0]  %s15_s11, 128, %s17_s13, [#allocation3], %s288_s17, %s288_s17, %s289_s18  }
   0x6   :  { %s290_s19 = smov [#allocation5]  }
   0x7   :  { %s29_s20 = sshll.u32 %s290_s19, 4  ;;  %s30_s20 = int_to_ptr.vmem [resolvable:$true] %s29_s20 }
   0x8   :  { %35 = dma.hbm_to_vmem [thread:$0]  %s28_s16, 1024, %s30_s20, [#allocation6], %s288_s17, %s288_s17, %s289_s18  }
   0x9   :  { %281 = dma.done.wait [#allocation3], 128  }
   0xa   :  { %282 = vsyncadd [#allocation3], 4294967168 }
   0xb   :  { %283 = dma.done.wait [#allocation6], 1024  }
   0xc   :  { %284 = vsyncadd [#allocation6], 4294966272  ;;  %v198_v0 = vld [vmem:[#allocation5 + $0x38] sm:$0xff]  ;;  %v197_v1 = vld [vmem:[#allocation5 + $0x30] sm:$0xff]  ;;  %s291_s0 = smov [#allocation7]   ;;  %s140_s23 = sshll.u32 %s327_s2, 4  ;;  %s141_s23 = int_to_ptr.hbm [resolvable:$true] %s140_s23 }
   0xd   :  { %116 = vmatpush.bf16.msra.mxu0 %v198_v0  ;;  %v196_v2 = vld [vmem:[#allocation5 + $0x28] sm:$0xff]  ;;  %v195_v3 = vld [vmem:[#allocation5 + $0x20] sm:$0xff]  ;;  %v194_v4 = vld [vmem:[#allocation5 + $0x18] sm:$0xff]  ;;  %s138_s1 = sshll.u32 %s291_s0, 4  ;;  %s139_s1 = int_to_ptr.vmem [resolvable:$true] %s138_s1 }
   0xe   :  { %v193_v5 = vld [vmem:[#allocation5 + $0x10] sm:$0xff]  ;;  %v192_v6 = vld [vmem:[#allocation5 + $0x8] sm:$0xff]  ;;  %v191_v7 = vld [vmem:[#allocation5] sm:$0xff] }
   0xf   :  { %v190_v8 = vld [vmem:[#allocation2] sm:$0xff] }
  0x11   :  { %117 = vmatpush.bf16.msra.mxu0 %v197_v1 }
  0x15   :  { %118 = vmatpush.bf16.msra.mxu0 %v196_v2 }
  0x19   :  { %119 = vmatpush.bf16.msra.mxu0 %v195_v3 }
  0x1d   :  { %120 = vmatpush.bf16.msra.mxu0 %v194_v4 }
  0x21   :  { %121 = vmatpush.bf16.msra.mxu0 %v193_v5 }
  0x25   :  { %122 = vmatpush.bf16.msra.mxu0 %v192_v6 }
  0x29   :  { %123 = vmatpush.bf16.msra.mxu0 %v191_v7 }
  0x2c   :  { %124 = vmatmul.bf16.vlgmr.msra.gmra.mxu0 %v190_v8 }
  0xa9   :  { %v125_v9 = vpop.f32.mrf.mxu0 }
  0xb1   :  { %v127_v10 = vpop.f32.mrf.mxu0 }
  0xb2   :  { %v202_v11 = vpack.c.bf16 %v127_v10, %v125_v9 }
  0xb4   :  { %203 = vst [vmem:[#allocation7] sm:$0xff] %v202_v11  }
  0xb5   :  { %146 = dma.vmem_to_hbm [thread:$0]  %s139_s1, 128, %s141_s23, [#allocation4], %s288_s17, %s288_s17, %s289_s18  }
  0xb6   :  { %285 = dma.done.wait [#allocation4], 128  }
  0xb7   :  { %286 = vsyncadd [#allocation4], 4294967168 }
  0xb8   :  { %151 = vsyncpa [#allocation3], 1 }
  0xb9   :  { %152 = vsyncpa [#allocation6], 1 }
  0xba   :  { %153 = vsyncpa [#allocation4], 1 }

</bundles_post_ra>
